<compile_context>
chip_gen: v7x
topology: tpu7x:2x2x1
jax: 0.10.0
libtpu: 0.0.40
codegen_flags: <defaults>
</compile_context>

<pallas_src>
import jax
import jax.numpy as jnp
from jax import lax
from jax.experimental import pallas as pl
from jax.experimental.pallas import tpu as pltpu

WORD_EMB_DIM = 50
POS_EMB_DIM = 50
HIDDEN_DIM = 200
TOTAL_EMB_DIM = WORD_EMB_DIM * 6 + POS_EMB_DIM * 6  # 600
LN_EPS = 1e-5


def _round_up(x, m):
    return ((x + m - 1) // m) * m


def _padded_bytes(shape, dtype):
    """Approximate VMEM footprint after (sublane, 128)-lane tile padding."""
    dt = jnp.dtype(dtype)
    sub = {4: 8, 2: 16, 1: 32}.get(dt.itemsize, 8)
    dims = list(shape)
    if len(dims) >= 1:
        dims[-1] = _round_up(dims[-1], 128)
    if len(dims) >= 2:
        dims[-2] = _round_up(dims[-2], sub)
    n = 1
    for d in dims:
        n *= d
    return n * dt.itemsize


def _layernorm(h, gamma, beta):
    # PyTorch LayerNorm: biased variance over the last dim, eps inside sqrt.
    mean = jnp.mean(h, axis=-1, keepdims=True)
    var = jnp.mean(jnp.square(h - mean), axis=-1, keepdims=True)
    return (h - mean) * lax.rsqrt(var + LN_EPS) * gamma + beta


def wordpos_kernel(ids_ref, tbl_ref,
                   b1_ref, g1_ref, be1_ref,
                   w2_ref, b2_ref, g2_ref, be2_ref,
                   w3_ref, b3_ref, out_ref):
    ids = ids_ref[...]                      # (tm, 12) int32; POS ids pre-offset by Vw
    tm = ids.shape[0]
    cdt = tbl_ref.dtype                     # matmul operand dtype (bf16)
    vc = tbl_ref.shape[1]                   # Vc_pad (multiple of 128)

    # --- sequential1: Linear(600, 200) fused with the embedding gather.
    # Each slot c contributes a combined two-hot (word row + shifted POS row)
    # times the host-precomputed projected table P_c (Vc_pad, 200).
    iota = lax.broadcasted_iota(jnp.int32, (tm, vc), 1)     # hoisted: built once
    h1 = jnp.zeros((tm, HIDDEN_DIM), jnp.float32)
    for c in range(6):
        wid = ids[:, c:c + 1]                               # (tm, 1)
        pid = ids[:, 6 + c:7 + c]                           # (tm, 1), already +Vw
        onehot = jnp.logical_or(iota == wid, iota == pid).astype(cdt)
        h1 = h1 + jnp.dot(onehot, tbl_ref[c],
                          preferred_element_type=jnp.float32)
    h1 = h1 + b1_ref[...]
    h1 = jnp.maximum(_layernorm(h1, g1_ref[...], be1_ref[...]), 0.0)
    # TODO(synk): Dropout(p=0.2) is identity in eval mode; training-mode RNG mask not implemented.

    # --- sequential2: Linear(200, 100) -> LayerNorm -> ReLU -> Dropout(eval=id)
    h2 = jnp.dot(h1.astype(cdt), w2_ref[...],
                 preferred_element_type=jnp.float32) + b2_ref[...]
    h2 = jnp.maximum(_layernorm(h2, g2_ref[...], be2_ref[...]), 0.0)

    # --- output Linear(100, out_pad) + LogSoftmax(dim=1).
    # Padded logit columns carry bias -1e30 (f32): never the max, exp() -> 0 in LSE.
    logits = jnp.dot(h2.astype(cdt), w3_ref[...],
                     preferred_element_type=jnp.float32) + b3_ref[...]
    m = jnp.max(logits, axis=-1, keepdims=True)
    shifted = logits - m
    lse = jnp.log(jnp.sum(jnp.exp(shifted), axis=-1, keepdims=True))
    out_ref[...] = (shifted - lse).astype(out_ref.dtype)


def init_params(key, word_vocab_size, pos_vocab_size, output_size):
    ks = jax.random.split(key, 8)

    def linear_init(kw, kb, fan_in, fan_out):
        bound = 1.0 / jnp.sqrt(jnp.float32(fan_in))
        w = jax.random.uniform(kw, (fan_in, fan_out), jnp.float32, -bound, bound)
        b = jax.random.uniform(kb, (1, fan_out), jnp.float32, -bound, bound)
        return w, b

    params = {}
    # nn.Embedding default init: N(0, 1)
    params["word_emb"] = jax.random.normal(ks[0], (word_vocab_size, WORD_EMB_DIM), jnp.float32)
    params["pos_emb"] = jax.random.normal(ks[1], (pos_vocab_size, POS_EMB_DIM), jnp.float32)
    params["w1"], params["b1"] = linear_init(ks[2], ks[3], TOTAL_EMB_DIM, HIDDEN_DIM)
    params["g1"] = jnp.ones((1, HIDDEN_DIM), jnp.float32)
    params["be1"] = jnp.zeros((1, HIDDEN_DIM), jnp.float32)
    params["w2"], params["b2"] = linear_init(ks[4], ks[5], HIDDEN_DIM, HIDDEN_DIM // 2)
    params["g2"] = jnp.ones((1, HIDDEN_DIM // 2), jnp.float32)
    params["be2"] = jnp.zeros((1, HIDDEN_DIM // 2), jnp.float32)
    params["w3"], params["b3"] = linear_init(ks[6], ks[7], HIDDEN_DIM // 2, output_size)
    return params


def _projected_tables(params, dtype=jnp.bfloat16):
    """Per-slot projected embedding tables P_c = [wemb@W1_word_c ; pemb@W1_pos_c].

    PyTorch flattening order is [w0|p0|w1|p1|...|w5|p5], so slot c uses
    W1 rows [100c:100c+50] for the word and [100c+50:100c+100] for the POS tag.
    Returns (6, Vc_pad, 200) in `dtype`, plus Vw (row offset of POS ids).
    """
    wemb = params["word_emb"].astype(dtype)
    pemb = params["pos_emb"].astype(dtype)
    w1 = params["w1"].astype(dtype)                       # (600, 200)
    vw, vp = wemb.shape[0], pemb.shape[0]
    vc_pad = _round_up(vw + vp, 128)                      # lane-dense one-hot width
    tabs = []
    for c in range(6):
        tw = jnp.dot(wemb, w1[100 * c:100 * c + 50],
                     preferred_element_type=jnp.float32)
        tp = jnp.dot(pemb, w1[100 * c + 50:100 * c + 100],
                     preferred_element_type=jnp.float32)
        t = jnp.concatenate([tw, tp], axis=0)
        t = jnp.pad(t, ((0, vc_pad - (vw + vp)), (0, 0)))
        tabs.append(t.astype(dtype))
    return jnp.stack(tabs, axis=0), vw


def wordpos_forward(params, x_ids, *, block_b=512, out_dtype=jnp.float32):
    """x_ids: (B, 12) int — first 6 columns word ids, last 6 POS ids."""
    B = x_ids.shape[0]
    output_size = params["w3"].shape[1]
    out_pad = _round_up(output_size, 128)

    tbl, vw = _projected_tables(params)                   # (6, Vc_pad, 200) bf16
    vc_pad = tbl.shape[1]
    if tbl.size * 2 > 48 * 1024 * 1024:
        # TODO(synk): large-vocab path (scalar-prefetched ids + DMA gather from
        # HBM instead of VMEM-resident projected tables) not implemented.
        raise NotImplementedError(
            "projected embedding tables exceed the VMEM budget for this kernel")

    # Batch tile: bf16-sublane friendly for small B, MXU-aligned (512) otherwise.
    tm = block_b if B >= block_b else _round_up(B, 16)
    b_pad = _round_up(B, tm)
    grid = (b_pad // tm,)

    ids = x_ids.astype(jnp.int32)
    # Offset POS ids into the combined table's row space so the kernel needs no Vw.
    ids = jnp.concatenate([ids[:, :6], ids[:, 6:] + vw], axis=1)
    if b_pad != B:
        ids = jnp.pad(ids, ((0, b_pad - B), (0, 0)))

    bf16 = jnp.bfloat16
    w2 = params["w2"].astype(bf16)
    w3 = jnp.pad(params["w3"], ((0, 0), (0, out_pad - output_size))).astype(bf16)
    b3 = jnp.pad(params["b3"], ((0, 0), (0, out_pad - output_size)),
                 constant_values=-1e30)                   # keep f32 (pad-bias trick)

    def resident(arr):
        nd = arr.ndim
        return pl.BlockSpec(arr.shape, lambda i, _nd=nd: (0,) * _nd)

    resident_arrays = [tbl, params["b1"], params["g1"], params["be1"],
                       w2, params["b2"], params["g2"], params["be2"], w3, b3]

    # Right-sized VMEM limit: resident buffers + double-buffered pipelined tiles + slack.
    vmem_bytes = sum(_padded_bytes(a.shape, a.dtype) for a in resident_arrays)
    vmem_bytes += 2 * (_padded_bytes((tm, 12), jnp.int32)
                       + _padded_bytes((tm, out_pad), out_dtype))
    vmem_bytes += 4 * 1024 * 1024
    vmem_limit = int(min(max(vmem_bytes, 8 * 1024 * 1024), 64 * 1024 * 1024))

    flops = 2 * b_pad * (6 * vc_pad * HIDDEN_DIM
                         + HIDDEN_DIM * (HIDDEN_DIM // 2)
                         + (HIDDEN_DIM // 2) * out_pad)
    transcendentals = b_pad * (out_pad + 4)
    bytes_accessed = (ids.size * 4
                      + sum(a.size * a.dtype.itemsize for a in resident_arrays)
                      + b_pad * out_pad * jnp.dtype(out_dtype).itemsize)

    out = pl.pallas_call(
        wordpos_kernel,
        out_shape=jax.ShapeDtypeStruct((b_pad, out_pad), out_dtype),
        grid=grid,
        in_specs=[pl.BlockSpec((tm, 12), lambda i: (i, 0))]    # ids tile (pipelined)
                 + [resident(a) for a in resident_arrays],     # weights stay VMEM-resident
        out_specs=pl.BlockSpec((tm, out_pad), lambda i: (i, 0)),
        compiler_params=pltpu.CompilerParams(
            dimension_semantics=("parallel",),
            vmem_limit_bytes=vmem_limit),
        cost_estimate=pl.CostEstimate(
            flops=int(flops),
            transcendentals=int(transcendentals),
            bytes_accessed=int(bytes_accessed)),
    )(ids, *resident_arrays)
    return out[:B, :output_size]


def reference_forward(params, x_ids):
    """Plain-JAX mirror of the kernel numerics (bf16 projected tables / matmul
    operands, f32 accumulation) — mathematically the PyTorch forward in eval mode."""
    bf16 = jnp.bfloat16
    ids = x_ids.astype(jnp.int32)
    tbl, vw = _projected_tables(params)
    B = ids.shape[0]
    h1 = jnp.zeros((B, HIDDEN_DIM), jnp.float32)
    for c in range(6):
        h1 = h1 + jnp.take(tbl[c], ids[:, c], axis=0).astype(jnp.float32)
        h1 = h1 + jnp.take(tbl[c], ids[:, 6 + c] + vw, axis=0).astype(jnp.float32)
    h1 = h1 + params["b1"]
    h1 = jnp.maximum(_layernorm(h1, params["g1"], params["be1"]), 0.0)
    h2 = jnp.dot(h1.astype(bf16), params["w2"].astype(bf16),
                 preferred_element_type=jnp.float32) + params["b2"]
    h2 = jnp.maximum(_layernorm(h2, params["g2"], params["be2"]), 0.0)
    logits = jnp.dot(h2.astype(bf16), params["w3"].astype(bf16),
                     preferred_element_type=jnp.float32) + params["b3"]
    return jax.nn.log_softmax(logits, axis=-1)


if __name__ == "__main__":
    key = jax.random.PRNGKey(0)
    k_param, k_word, k_pos = jax.random.split(key, 3)

    word_vocab_size = 100
    pos_vocab_size = 20
    output_size = 64
    batch = 8

    params = init_params(k_param, word_vocab_size, pos_vocab_size, output_size)

    word_ids = jax.random.randint(k_word, (batch, 6), 0, word_vocab_size, dtype=jnp.int32)
    pos_ids = jax.random.randint(k_pos, (batch, 6), 0, pos_vocab_size, dtype=jnp.int32)
    x = jnp.concatenate([word_ids, pos_ids], axis=1)  # (B, 12)

    out = wordpos_forward(params, x)
    jax.block_until_ready(out)

    assert out.shape == (batch, output_size)
    # Sanity: rows of log-softmax should exponentiate-and-sum to ~1.
    row_sums = jnp.sum(jnp.exp(out), axis=1)
    assert bool(jnp.all(jnp.abs(row_sums - 1.0) < 1e-3))
    # Numerical check against the plain-JAX mirror.
    ref = reference_forward(params, x)
    assert bool(jnp.all(jnp.abs(out - ref) < 2e-3)), float(jnp.max(jnp.abs(out - ref)))

    print("KERNEL_OK")
</pallas_src>

<mosaic_0001>
module attributes {stable_mosaic.version = 11 : i64} {
  func.func @wordpos_kernel(%arg0: i32, %arg1: memref<16x12xi32, #tpu.memory_space<vmem>>, %arg2: memref<6x128x200xbf16, #tpu.memory_space<vmem>>, %arg3: memref<1x200xf32, #tpu.memory_space<vmem>>, %arg4: memref<1x200xf32, #tpu.memory_space<vmem>>, %arg5: memref<1x200xf32, #tpu.memory_space<vmem>>, %arg6: memref<200x100xbf16, #tpu.memory_space<vmem>>, %arg7: memref<1x100xf32, #tpu.memory_space<vmem>>, %arg8: memref<1x100xf32, #tpu.memory_space<vmem>>, %arg9: memref<1x100xf32, #tpu.memory_space<vmem>>, %arg10: memref<100x128xbf16, #tpu.memory_space<vmem>>, %arg11: memref<1x128xf32, #tpu.memory_space<vmem>>, %arg12: memref<16x128xf32, #tpu.memory_space<vmem>>) attributes {dimension_semantics = [#tpu.dimension_semantics<parallel>], iteration_bounds = array<i64: 1>, scalar_prefetch = 0 : i64, scratch_operands = 0 : i64, tpu.core_type = #tpu.core_type<tc>, window_params = [{transform_indices = @transform_0, window_bounds = array<i64: 16, 12>}, {pipeline_mode = #tpu.pipeline_mode<synchronous>, transform_indices = @transform_1, window_bounds = array<i64: 6, 128, 200>}, {pipeline_mode = #tpu.pipeline_mode<synchronous>, transform_indices = @transform_2, window_bounds = array<i64: 1, 200>}, {pipeline_mode = #tpu.pipeline_mode<synchronous>, transform_indices = @transform_3, window_bounds = array<i64: 1, 200>}, {pipeline_mode = #tpu.pipeline_mode<synchronous>, transform_indices = @transform_4, window_bounds = array<i64: 1, 200>}, {pipeline_mode = #tpu.pipeline_mode<synchronous>, transform_indices = @transform_5, window_bounds = array<i64: 200, 100>}, {pipeline_mode = #tpu.pipeline_mode<synchronous>, transform_indices = @transform_6, window_bounds = array<i64: 1, 100>}, {pipeline_mode = #tpu.pipeline_mode<synchronous>, transform_indices = @transform_7, window_bounds = array<i64: 1, 100>}, {pipeline_mode = #tpu.pipeline_mode<synchronous>, transform_indices = @transform_8, window_bounds = array<i64: 1, 100>}, {pipeline_mode = #tpu.pipeline_mode<synchronous>, transform_indices = @transform_9, window_bounds = array<i64: 100, 128>}, {pipeline_mode = #tpu.pipeline_mode<synchronous>, transform_indices = @transform_10, window_bounds = array<i64: 1, 128>}, {transform_indices = @transform_11, window_bounds = array<i64: 16, 128>}]} {
    %c0 = arith.constant 0 : index
    %c0_0 = arith.constant 0 : index
    %0 = vector.load %arg1[%c0, %c0_0] : memref<16x12xi32, #tpu.memory_space<vmem>>, vector<16x12xi32>
    %1 = tpu.iota {dimensions = array<i32: 1>} : vector<16x128xi32>
    %cst = arith.constant 0.000000e+00 : f32
    %2 = vector.broadcast %cst : f32 to vector<16x200xf32>
    %3 = vector.extract_strided_slice %0 {offsets = [0, 0], sizes = [16, 1], strides = [1, 1]} : vector<16x12xi32> to vector<16x1xi32>
    %4 = vector.extract_strided_slice %0 {offsets = [0, 6], sizes = [16, 1], strides = [1, 1]} : vector<16x12xi32> to vector<16x1xi32>
    %5 = vector.broadcast %3 : vector<16x1xi32> to vector<16x128xi32>
    %6 = arith.cmpi eq, %1, %5 : vector<16x128xi32>
    %7 = vector.broadcast %4 : vector<16x1xi32> to vector<16x128xi32>
    %8 = arith.cmpi eq, %1, %7 : vector<16x128xi32>
    %9 = arith.ori %6, %8 : vector<16x128xi1>
    %10 = arith.extui %9 : vector<16x128xi1> to vector<16x128xi32>
    %11 = arith.sitofp %10 : vector<16x128xi32> to vector<16x128xf32>
    %12 = arith.truncf %11 : vector<16x128xf32> to vector<16x128xbf16>
    %c0_1 = arith.constant 0 : index
    %c0_2 = arith.constant 0 : index
    %c0_3 = arith.constant 0 : index
    %13 = vector.load %arg2[%c0_1, %c0_2, %c0_3] : memref<6x128x200xbf16, #tpu.memory_space<vmem>>, vector<1x128x200xbf16>
    %14 = vector.shape_cast %13 : vector<1x128x200xbf16> to vector<128x200xbf16>
    %cst_4 = arith.constant dense<0.000000e+00> : vector<16x200xf32>
    %15 = tpu.matmul %12, %14, %cst_4 {dimension_numbers = #tpu.dot_dimension_numbers<[1], [0], [0], [1], [0, 0, 1, 1], [], []>} : vector<16x128xbf16>, vector<128x200xbf16>, vector<16x200xf32> -> vector<16x200xf32>
    %16 = arith.addf %2, %15 : vector<16x200xf32>
    %17 = vector.extract_strided_slice %0 {offsets = [0, 1], sizes = [16, 1], strides = [1, 1]} : vector<16x12xi32> to vector<16x1xi32>
    %18 = vector.extract_strided_slice %0 {offsets = [0, 7], sizes = [16, 1], strides = [1, 1]} : vector<16x12xi32> to vector<16x1xi32>
    %19 = vector.broadcast %17 : vector<16x1xi32> to vector<16x128xi32>
    %20 = arith.cmpi eq, %1, %19 : vector<16x128xi32>
    %21 = vector.broadcast %18 : vector<16x1xi32> to vector<16x128xi32>
    %22 = arith.cmpi eq, %1, %21 : vector<16x128xi32>
    %23 = arith.ori %20, %22 : vector<16x128xi1>
    %24 = arith.extui %23 : vector<16x128xi1> to vector<16x128xi32>
    %25 = arith.sitofp %24 : vector<16x128xi32> to vector<16x128xf32>
    %26 = arith.truncf %25 : vector<16x128xf32> to vector<16x128xbf16>
    %c1 = arith.constant 1 : index
    %c0_5 = arith.constant 0 : index
    %c0_6 = arith.constant 0 : index
    %27 = vector.load %arg2[%c1, %c0_5, %c0_6] : memref<6x128x200xbf16, #tpu.memory_space<vmem>>, vector<1x128x200xbf16>
    %28 = vector.shape_cast %27 : vector<1x128x200xbf16> to vector<128x200xbf16>
    %cst_7 = arith.constant dense<0.000000e+00> : vector<16x200xf32>
    %29 = tpu.matmul %26, %28, %cst_7 {dimension_numbers = #tpu.dot_dimension_numbers<[1], [0], [0], [1], [0, 0, 1, 1], [], []>} : vector<16x128xbf16>, vector<128x200xbf16>, vector<16x200xf32> -> vector<16x200xf32>
    %30 = arith.addf %16, %29 : vector<16x200xf32>
    %31 = vector.extract_strided_slice %0 {offsets = [0, 2], sizes = [16, 1], strides = [1, 1]} : vector<16x12xi32> to vector<16x1xi32>
    %32 = vector.extract_strided_slice %0 {offsets = [0, 8], sizes = [16, 1], strides = [1, 1]} : vector<16x12xi32> to vector<16x1xi32>
    %33 = vector.broadcast %31 : vector<16x1xi32> to vector<16x128xi32>
    %34 = arith.cmpi eq, %1, %33 : vector<16x128xi32>
    %35 = vector.broadcast %32 : vector<16x1xi32> to vector<16x128xi32>
    %36 = arith.cmpi eq, %1, %35 : vector<16x128xi32>
    %37 = arith.ori %34, %36 : vector<16x128xi1>
    %38 = arith.extui %37 : vector<16x128xi1> to vector<16x128xi32>
    %39 = arith.sitofp %38 : vector<16x128xi32> to vector<16x128xf32>
    %40 = arith.truncf %39 : vector<16x128xf32> to vector<16x128xbf16>
    %c2 = arith.constant 2 : index
    %c0_8 = arith.constant 0 : index
    %c0_9 = arith.constant 0 : index
    %41 = vector.load %arg2[%c2, %c0_8, %c0_9] : memref<6x128x200xbf16, #tpu.memory_space<vmem>>, vector<1x128x200xbf16>
    %42 = vector.shape_cast %41 : vector<1x128x200xbf16> to vector<128x200xbf16>
    %cst_10 = arith.constant dense<0.000000e+00> : vector<16x200xf32>
    %43 = tpu.matmul %40, %42, %cst_10 {dimension_numbers = #tpu.dot_dimension_numbers<[1], [0], [0], [1], [0, 0, 1, 1], [], []>} : vector<16x128xbf16>, vector<128x200xbf16>, vector<16x200xf32> -> vector<16x200xf32>
    %44 = arith.addf %30, %43 : vector<16x200xf32>
    %45 = vector.extract_strided_slice %0 {offsets = [0, 3], sizes = [16, 1], strides = [1, 1]} : vector<16x12xi32> to vector<16x1xi32>
    %46 = vector.extract_strided_slice %0 {offsets = [0, 9], sizes = [16, 1], strides = [1, 1]} : vector<16x12xi32> to vector<16x1xi32>
    %47 = vector.broadcast %45 : vector<16x1xi32> to vector<16x128xi32>
    %48 = arith.cmpi eq, %1, %47 : vector<16x128xi32>
    %49 = vector.broadcast %46 : vector<16x1xi32> to vector<16x128xi32>
    %50 = arith.cmpi eq, %1, %49 : vector<16x128xi32>
    %51 = arith.ori %48, %50 : vector<16x128xi1>
    %52 = arith.extui %51 : vector<16x128xi1> to vector<16x128xi32>
    %53 = arith.sitofp %52 : vector<16x128xi32> to vector<16x128xf32>
    %54 = arith.truncf %53 : vector<16x128xf32> to vector<16x128xbf16>
    %c3 = arith.constant 3 : index
    %c0_11 = arith.constant 0 : index
    %c0_12 = arith.constant 0 : index
    %55 = vector.load %arg2[%c3, %c0_11, %c0_12] : memref<6x128x200xbf16, #tpu.memory_space<vmem>>, vector<1x128x200xbf16>
    %56 = vector.shape_cast %55 : vector<1x128x200xbf16> to vector<128x200xbf16>
    %cst_13 = arith.constant dense<0.000000e+00> : vector<16x200xf32>
    %57 = tpu.matmul %54, %56, %cst_13 {dimension_numbers = #tpu.dot_dimension_numbers<[1], [0], [0], [1], [0, 0, 1, 1], [], []>} : vector<16x128xbf16>, vector<128x200xbf16>, vector<16x200xf32> -> vector<16x200xf32>
    %58 = arith.addf %44, %57 : vector<16x200xf32>
    %59 = vector.extract_strided_slice %0 {offsets = [0, 4], sizes = [16, 1], strides = [1, 1]} : vector<16x12xi32> to vector<16x1xi32>
    %60 = vector.extract_strided_slice %0 {offsets = [0, 10], sizes = [16, 1], strides = [1, 1]} : vector<16x12xi32> to vector<16x1xi32>
    %61 = vector.broadcast %59 : vector<16x1xi32> to vector<16x128xi32>
    %62 = arith.cmpi eq, %1, %61 : vector<16x128xi32>
    %63 = vector.broadcast %60 : vector<16x1xi32> to vector<16x128xi32>
    %64 = arith.cmpi eq, %1, %63 : vector<16x128xi32>
    %65 = arith.ori %62, %64 : vector<16x128xi1>
    %66 = arith.extui %65 : vector<16x128xi1> to vector<16x128xi32>
    %67 = arith.sitofp %66 : vector<16x128xi32> to vector<16x128xf32>
    %68 = arith.truncf %67 : vector<16x128xf32> to vector<16x128xbf16>
    %c4 = arith.constant 4 : index
    %c0_14 = arith.constant 0 : index
    %c0_15 = arith.constant 0 : index
    %69 = vector.load %arg2[%c4, %c0_14, %c0_15] : memref<6x128x200xbf16, #tpu.memory_space<vmem>>, vector<1x128x200xbf16>
    %70 = vector.shape_cast %69 : vector<1x128x200xbf16> to vector<128x200xbf16>
    %cst_16 = arith.constant dense<0.000000e+00> : vector<16x200xf32>
    %71 = tpu.matmul %68, %70, %cst_16 {dimension_numbers = #tpu.dot_dimension_numbers<[1], [0], [0], [1], [0, 0, 1, 1], [], []>} : vector<16x128xbf16>, vector<128x200xbf16>, vector<16x200xf32> -> vector<16x200xf32>
    %72 = arith.addf %58, %71 : vector<16x200xf32>
    %73 = vector.extract_strided_slice %0 {offsets = [0, 5], sizes = [16, 1], strides = [1, 1]} : vector<16x12xi32> to vector<16x1xi32>
    %74 = vector.extract_strided_slice %0 {offsets = [0, 11], sizes = [16, 1], strides = [1, 1]} : vector<16x12xi32> to vector<16x1xi32>
    %75 = vector.broadcast %73 : vector<16x1xi32> to vector<16x128xi32>
    %76 = arith.cmpi eq, %1, %75 : vector<16x128xi32>
    %77 = vector.broadcast %74 : vector<16x1xi32> to vector<16x128xi32>
    %78 = arith.cmpi eq, %1, %77 : vector<16x128xi32>
    %79 = arith.ori %76, %78 : vector<16x128xi1>
    %80 = arith.extui %79 : vector<16x128xi1> to vector<16x128xi32>
    %81 = arith.sitofp %80 : vector<16x128xi32> to vector<16x128xf32>
    %82 = arith.truncf %81 : vector<16x128xf32> to vector<16x128xbf16>
    %c5 = arith.constant 5 : index
    %c0_17 = arith.constant 0 : index
    %c0_18 = arith.constant 0 : index
    %83 = vector.load %arg2[%c5, %c0_17, %c0_18] : memref<6x128x200xbf16, #tpu.memory_space<vmem>>, vector<1x128x200xbf16>
    %84 = vector.shape_cast %83 : vector<1x128x200xbf16> to vector<128x200xbf16>
    %cst_19 = arith.constant dense<0.000000e+00> : vector<16x200xf32>
    %85 = tpu.matmul %82, %84, %cst_19 {dimension_numbers = #tpu.dot_dimension_numbers<[1], [0], [0], [1], [0, 0, 1, 1], [], []>} : vector<16x128xbf16>, vector<128x200xbf16>, vector<16x200xf32> -> vector<16x200xf32>
    %86 = arith.addf %72, %85 : vector<16x200xf32>
    %c0_20 = arith.constant 0 : index
    %c0_21 = arith.constant 0 : index
    %87 = vector.load %arg3[%c0_20, %c0_21] : memref<1x200xf32, #tpu.memory_space<vmem>>, vector<1x200xf32>
    %88 = vector.broadcast %87 : vector<1x200xf32> to vector<16x200xf32>
    %89 = arith.addf %86, %88 : vector<16x200xf32>
    %c0_22 = arith.constant 0 : index
    %c0_23 = arith.constant 0 : index
    %90 = vector.load %arg4[%c0_22, %c0_23] : memref<1x200xf32, #tpu.memory_space<vmem>>, vector<1x200xf32>
    %c0_24 = arith.constant 0 : index
    %c0_25 = arith.constant 0 : index
    %91 = vector.load %arg5[%c0_24, %c0_25] : memref<1x200xf32, #tpu.memory_space<vmem>>, vector<1x200xf32>
    %cst_26 = arith.constant dense<0.000000e+00> : vector<16xf32>
    %92 = vector.multi_reduction <add>, %89, %cst_26 [1] : vector<16x200xf32> to vector<16xf32>
    %93 = vector.shape_cast %92 : vector<16xf32> to vector<16x1xf32>
    %cst_27 = arith.constant 2.000000e+02 : f32
    %94 = vector.broadcast %cst_27 : f32 to vector<16x1xf32>
    %95 = arith.divf %93, %94 : vector<16x1xf32>
    %96 = vector.broadcast %95 : vector<16x1xf32> to vector<16x200xf32>
    %97 = arith.subf %89, %96 : vector<16x200xf32>
    %98 = arith.mulf %97, %97 : vector<16x200xf32>
    %cst_28 = arith.constant dense<0.000000e+00> : vector<16xf32>
    %99 = vector.multi_reduction <add>, %98, %cst_28 [1] : vector<16x200xf32> to vector<16xf32>
    %100 = vector.shape_cast %99 : vector<16xf32> to vector<16x1xf32>
    %cst_29 = arith.constant 2.000000e+02 : f32
    %101 = vector.broadcast %cst_29 : f32 to vector<16x1xf32>
    %102 = arith.divf %100, %101 : vector<16x1xf32>
    %103 = vector.broadcast %95 : vector<16x1xf32> to vector<16x200xf32>
    %104 = arith.subf %89, %103 : vector<16x200xf32>
    %cst_30 = arith.constant 9.99999974E-6 : f32
    %105 = vector.broadcast %cst_30 : f32 to vector<16x1xf32>
    %106 = arith.addf %102, %105 : vector<16x1xf32>
    %107 = math.rsqrt %106 : vector<16x1xf32>
    %108 = vector.broadcast %107 : vector<16x1xf32> to vector<16x200xf32>
    %109 = arith.mulf %104, %108 : vector<16x200xf32>
    %110 = vector.broadcast %90 : vector<1x200xf32> to vector<16x200xf32>
    %111 = arith.mulf %109, %110 : vector<16x200xf32>
    %112 = vector.broadcast %91 : vector<1x200xf32> to vector<16x200xf32>
    %113 = arith.addf %111, %112 : vector<16x200xf32>
    %cst_31 = arith.constant 0.000000e+00 : f32
    %114 = vector.broadcast %cst_31 : f32 to vector<16x200xf32>
    %115 = arith.maximumf %113, %114 : vector<16x200xf32>
    %116 = arith.truncf %115 : vector<16x200xf32> to vector<16x200xbf16>
    %c0_32 = arith.constant 0 : index
    %c0_33 = arith.constant 0 : index
    %117 = vector.load %arg6[%c0_32, %c0_33] : memref<200x100xbf16, #tpu.memory_space<vmem>>, vector<200x100xbf16>
    %cst_34 = arith.constant dense<0.000000e+00> : vector<16x100xf32>
    %118 = tpu.matmul %116, %117, %cst_34 {dimension_numbers = #tpu.dot_dimension_numbers<[1], [0], [0], [1], [0, 0, 1, 1], [], []>} : vector<16x200xbf16>, vector<200x100xbf16>, vector<16x100xf32> -> vector<16x100xf32>
    %c0_35 = arith.constant 0 : index
    %c0_36 = arith.constant 0 : index
    %119 = vector.load %arg7[%c0_35, %c0_36] : memref<1x100xf32, #tpu.memory_space<vmem>>, vector<1x100xf32>
    %120 = vector.broadcast %119 : vector<1x100xf32> to vector<16x100xf32>
    %121 = arith.addf %118, %120 : vector<16x100xf32>
    %c0_37 = arith.constant 0 : index
    %c0_38 = arith.constant 0 : index
    %122 = vector.load %arg8[%c0_37, %c0_38] : memref<1x100xf32, #tpu.memory_space<vmem>>, vector<1x100xf32>
    %c0_39 = arith.constant 0 : index
    %c0_40 = arith.constant 0 : index
    %123 = vector.load %arg9[%c0_39, %c0_40] : memref<1x100xf32, #tpu.memory_space<vmem>>, vector<1x100xf32>
    %cst_41 = arith.constant dense<0.000000e+00> : vector<16xf32>
    %124 = vector.multi_reduction <add>, %121, %cst_41 [1] : vector<16x100xf32> to vector<16xf32>
    %125 = vector.shape_cast %124 : vector<16xf32> to vector<16x1xf32>
    %cst_42 = arith.constant 1.000000e+02 : f32
    %126 = vector.broadcast %cst_42 : f32 to vector<16x1xf32>
    %127 = arith.divf %125, %126 : vector<16x1xf32>
    %128 = vector.broadcast %127 : vector<16x1xf32> to vector<16x100xf32>
    %129 = arith.subf %121, %128 : vector<16x100xf32>
    %130 = arith.mulf %129, %129 : vector<16x100xf32>
    %cst_43 = arith.constant dense<0.000000e+00> : vector<16xf32>
    %131 = vector.multi_reduction <add>, %130, %cst_43 [1] : vector<16x100xf32> to vector<16xf32>
    %132 = vector.shape_cast %131 : vector<16xf32> to vector<16x1xf32>
    %cst_44 = arith.constant 1.000000e+02 : f32
    %133 = vector.broadcast %cst_44 : f32 to vector<16x1xf32>
    %134 = arith.divf %132, %133 : vector<16x1xf32>
    %135 = vector.broadcast %127 : vector<16x1xf32> to vector<16x100xf32>
    %136 = arith.subf %121, %135 : vector<16x100xf32>
    %cst_45 = arith.constant 9.99999974E-6 : f32
    %137 = vector.broadcast %cst_45 : f32 to vector<16x1xf32>
    %138 = arith.addf %134, %137 : vector<16x1xf32>
    %139 = math.rsqrt %138 : vector<16x1xf32>
    %140 = vector.broadcast %139 : vector<16x1xf32> to vector<16x100xf32>
    %141 = arith.mulf %136, %140 : vector<16x100xf32>
    %142 = vector.broadcast %122 : vector<1x100xf32> to vector<16x100xf32>
    %143 = arith.mulf %141, %142 : vector<16x100xf32>
    %144 = vector.broadcast %123 : vector<1x100xf32> to vector<16x100xf32>
    %145 = arith.addf %143, %144 : vector<16x100xf32>
    %cst_46 = arith.constant 0.000000e+00 : f32
    %146 = vector.broadcast %cst_46 : f32 to vector<16x100xf32>
    %147 = arith.maximumf %145, %146 : vector<16x100xf32>
    %148 = arith.truncf %147 : vector<16x100xf32> to vector<16x100xbf16>
    %c0_47 = arith.constant 0 : index
    %c0_48 = arith.constant 0 : index
    %149 = vector.load %arg10[%c0_47, %c0_48] : memref<100x128xbf16, #tpu.memory_space<vmem>>, vector<100x128xbf16>
    %cst_49 = arith.constant dense<0.000000e+00> : vector<16x128xf32>
    %150 = tpu.matmul %148, %149, %cst_49 {dimension_numbers = #tpu.dot_dimension_numbers<[1], [0], [0], [1], [0, 0, 1, 1], [], []>} : vector<16x100xbf16>, vector<100x128xbf16>, vector<16x128xf32> -> vector<16x128xf32>
    %c0_50 = arith.constant 0 : index
    %c0_51 = arith.constant 0 : index
    %151 = vector.load %arg11[%c0_50, %c0_51] : memref<1x128xf32, #tpu.memory_space<vmem>>, vector<1x128xf32>
    %152 = vector.broadcast %151 : vector<1x128xf32> to vector<16x128xf32>
    %153 = arith.addf %150, %152 : vector<16x128xf32>
    %cst_52 = arith.constant dense<0xFF800000> : vector<16xf32>
    %154 = vector.multi_reduction <maximumf>, %153, %cst_52 [1] : vector<16x128xf32> to vector<16xf32>
    %155 = vector.shape_cast %154 : vector<16xf32> to vector<16x1xf32>
    %156 = vector.broadcast %155 : vector<16x1xf32> to vector<16x128xf32>
    %157 = arith.subf %153, %156 : vector<16x128xf32>
    %158 = math.exp %157 : vector<16x128xf32>
    %cst_53 = arith.constant dense<0.000000e+00> : vector<16xf32>
    %159 = vector.multi_reduction <add>, %158, %cst_53 [1] : vector<16x128xf32> to vector<16xf32>
    %160 = vector.shape_cast %159 : vector<16xf32> to vector<16x1xf32>
    %161 = math.log %160 : vector<16x1xf32>
    %162 = vector.broadcast %161 : vector<16x1xf32> to vector<16x128xf32>
    %163 = arith.subf %157, %162 : vector<16x128xf32>
    %c0_54 = arith.constant 0 : index
    %c0_55 = arith.constant 0 : index
    %164 = vector.load %arg12[%c0_54, %c0_55] : memref<16x128xf32, #tpu.memory_space<vmem>>, vector<16x128xf32>
    tpu.vector_store %arg12[%c0_54, %c0_55], %163 {strides = array<i32>} : memref<16x128xf32, #tpu.memory_space<vmem>>, vector<16x128xf32>,
    return
  }
  func.func @transform_0(%arg0: i32) -> (i32, i32) {
    %c0_i32 = arith.constant 0 : i32
    %c0_i32_0 = arith.constant 0 : i32
    return %arg0, %c0_i32 : i32, i32
  }
  func.func @transform_1(%arg0: i32) -> (i32, i32, i32) {
    %c0_i32 = arith.constant 0 : i32
    %c0_i32_0 = arith.constant 0 : i32
    %c0_i32_1 = arith.constant 0 : i32
    %c0_i32_2 = arith.constant 0 : i32
    return %c0_i32, %c0_i32_0, %c0_i32_1 : i32, i32, i32
  }
  func.func @transform_2(%arg0: i32) -> (i32, i32) {
    %c0_i32 = arith.constant 0 : i32
    %c0_i32_0 = arith.constant 0 : i32
    %c0_i32_1 = arith.constant 0 : i32
    return %c0_i32, %c0_i32_0 : i32, i32
  }
  func.func @transform_3(%arg0: i32) -> (i32, i32) {
    %c0_i32 = arith.constant 0 : i32
    %c0_i32_0 = arith.constant 0 : i32
    %c0_i32_1 = arith.constant 0 : i32
    return %c0_i32, %c0_i32_0 : i32, i32
  }
  func.func @transform_4(%arg0: i32) -> (i32, i32) {
    %c0_i32 = arith.constant 0 : i32
    %c0_i32_0 = arith.constant 0 : i32
    %c0_i32_1 = arith.constant 0 : i32
    return %c0_i32, %c0_i32_0 : i32, i32
  }
  func.func @transform_5(%arg0: i32) -> (i32, i32) {
    %c0_i32 = arith.constant 0 : i32
    %c0_i32_0 = arith.constant 0 : i32
    %c0_i32_1 = arith.constant 0 : i32
    return %c0_i32, %c0_i32_0 : i32, i32
  }
  func.func @transform_6(%arg0: i32) -> (i32, i32) {
    %c0_i32 = arith.constant 0 : i32
    %c0_i32_0 = arith.constant 0 : i32
    %c0_i32_1 = arith.constant 0 : i32
    return %c0_i32, %c0_i32_0 : i32, i32
  }
  func.func @transform_7(%arg0: i32) -> (i32, i32) {
    %c0_i32 = arith.constant 0 : i32
    %c0_i32_0 = arith.constant 0 : i32
    %c0_i32_1 = arith.constant 0 : i32
    return %c0_i32, %c0_i32_0 : i32, i32
  }
  func.func @transform_8(%arg0: i32) -> (i32, i32) {
    %c0_i32 = arith.constant 0 : i32
    %c0_i32_0 = arith.constant 0 : i32
    %c0_i32_1 = arith.constant 0 : i32
    return %c0_i32, %c0_i32_0 : i32, i32
  }
  func.func @transform_9(%arg0: i32) -> (i32, i32) {
    %c0_i32 = arith.constant 0 : i32
    %c0_i32_0 = arith.constant 0 : i32
    %c0_i32_1 = arith.constant 0 : i32
    return %c0_i32, %c0_i32_0 : i32, i32
  }
  func.func @transform_10(%arg0: i32) -> (i32, i32) {
    %c0_i32 = arith.constant 0 : i32
    %c0_i32_0 = arith.constant 0 : i32
    %c0_i32_1 = arith.constant 0 : i32
    return %c0_i32, %c0_i32_0 : i32, i32
  }
  func.func @transform_11(%arg0: i32) -> (i32, i32) {
    %c0_i32 = arith.constant 0 : i32
    %c0_i32_0 = arith.constant 0 : i32
    return %arg0, %c0_i32 : i32, i32
  }
}

</mosaic_0001>

<bundles_post_ra>
// kernel: tpu_custom_call.1
= control target key start
LH: loop header
LB: loop body
LE: loop exit
PB: predicated region body
PF: predicated region fallthrough
CT: control target
= control target key end

     0   :  { %v1991_v1 = vmov 8   ;;  %v1992_v2 = vmov 2   ;;  %v1993_v6 = vmov 0   ;;  %v1994_v12 = vmov 3   ;;  %s2568_s0 = inlined_call_operand.vmem [shape: s32[16,12], index: 0, kind: input, shape index: {}]   ;;  %s2569_s1 = inlined_call_operand.vmem [shape: bf16[6,128,200], index: 1, kind: input, shape index: {}]   ;;  %s2570_s2 = inlined_call_operand.vmem [shape: f32[1,200], index: 2, kind: input, shape index: {}]   ;;  %s2571_s3 = inlined_call_operand.vmem [shape: f32[1,200], index: 3, kind: input, shape index: {}]   ;;  %s2572_s4 = inlined_call_operand.vmem [shape: f32[1,200], index: 4, kind: input, shape index: {}]   ;;  %s2573_s5 = inlined_call_operand.vmem [shape: bf16[200,100], index: 5, kind: input, shape index: {}]   ;;  %s2574_s6 = inlined_call_operand.vmem [shape: f32[1,100], index: 6, kind: input, shape index: {}]   ;;  %s2575_s7 = inlined_call_operand.vmem [shape: f32[1,100], index: 7, kind: input, shape index: {}]   ;;  %s2576_s8 = inlined_call_operand.vmem [shape: f32[1,100], index: 8, kind: input, shape index: {}]   ;;  %s2577_s9 = inlined_call_operand.vmem [shape: bf16[100,128], index: 9, kind: input, shape index: {}]   ;;  %s2578_s10 = inlined_call_operand.vmem [shape: f32[1,128], index: 10, kind: input, shape index: {}]   ;;  %s2579_s11 = inlined_call_operand.hbm [shape: f32[16,128], index: 11, kind: output, shape index: {}]  }
   0x1   :  { %v2072_v0 = vld [vmem:[%s2568_s0] sm:$0xff]  ;;  %1769 = vset.pattern.permute.xlu1 %v1991_v1  ;;  %1768 = vset.pattern.permute.xlu0 %v1992_v2  ;;  %v2079_v3 = vld [vmem:[%s2568_s0 + $0x8] sm:$0xff]  ;;  %v1790_v7 = vld [vmem:[%s2569_s1 + $0x114] ss:$8 sps:$4 sm:$0xff]   ;;  %v1995_v19 = vmov 9   ;;  %v1996_v25 = vmov 1  }
   0x2   :  { %378 = vperm.xlu1 %1769, %v2072_v0   ;;  %370 = vperm.xlu0 %1768, %v2072_v0   ;;  %v1787_v4 = vld [vmem:[%s2569_s1 + $0x104] ss:$8 sps:$4 sm:$0xff]   ;;  %v1789_v5 = vld [vmem:[%s2569_s1 + $0x100] ss:$8 sps:$4 sm:$0xff]   ;;  %v1792_v8 = vld [vmem:[%s2569_s1 + $0x110] ss:$8 sps:$4 sm:$0xff]  }
   0x3   :  { %521 = vmatprep.mubr.bf16.mxu0 %v1993_v6  ;;  %235 = vmatprep.mubr.bf16.mxu1 %v1993_v6  ;;  %v1793_v9 = vld [vmem:[%s2569_s1 + $0x124] ss:$8 sps:$4 sm:$0xff]   ;;  %v1795_v10 = vld [vmem:[%s2569_s1 + $0x120] ss:$8 sps:$4 sm:$0xff]   ;;  %v1796_v11 = vld [vmem:[%s2569_s1 + $0x134] ss:$8 sps:$4 sm:$0xff]  }
   0x4   :  { %489 = vmatprep.subr.bf16.mxu0 %v1787_v4  ;;  %v1805_v13 = vld [vmem:[%s2569_s1 + $0x84] ss:$8 sps:$4 sm:$0xff]   ;;  %v1798_v14 = vld [vmem:[%s2569_s1 + $0x130] ss:$8 sps:$4 sm:$0xff]   ;;  %v1809_v15 = vld [vmem:[%s2569_s1 + $0x80] ss:$8 sps:$4 sm:$0xff]  }
   0x5   :  { %490 = vmatpush1.bf16.msra.mxu0 %v1789_v5  ;;  %203 = vmatprep.subr.bf16.mxu1 %v1805_v13  ;;  %v1811_v16 = vld [vmem:[%s2569_s1 + $0x94] ss:$8 sps:$4 sm:$0xff]   ;;  %v1799_v17 = vld [vmem:[%s2569_s1 + $0x144] ss:$8 sps:$4 sm:$0xff]   ;;  %v1815_v18 = vld [vmem:[%s2569_s1 + $0x90] ss:$8 sps:$4 sm:$0xff]  }
   0x6   :  { %381 = vperm.xlu1 %1769, %v2079_v3   ;;  %373 = vperm.xlu0 %1768, %v2079_v3   ;;  %v1817_v20 = vld [vmem:[%s2569_s1 + $0xa4] ss:$8 sps:$4 sm:$0xff]   ;;  %v1801_v21 = vld [vmem:[%s2569_s1 + $0x140] ss:$8 sps:$4 sm:$0xff]   ;;  %v1802_v22 = vld [vmem:[%s2569_s1 + $0x154] ss:$8 sps:$4 sm:$0xff]  }
   0x7   :  { %491 = vmatprep.subr.bf16.mxu0 %v1790_v7  ;;  %204 = vmatpush1.bf16.msra.mxu1 %v1809_v15  ;;  %v1822_v23 = vld [vmem:[%s2569_s1 + $0xa0] ss:$8 sps:$4 sm:$0xff]   ;;  %v1823_v24 = vld [vmem:[%s2569_s1 + $0xb4] ss:$8 sps:$4 sm:$0xff]   ;;  %v1997_v26 = vmov 7   ;;  %v1998_v31 = vmov 4  }
   0x8   :  { %205 = vmatprep.subr.bf16.mxu1 %v1811_v16  ;;  %v1804_v27 = vld [vmem:[%s2569_s1 + $0x150] ss:$8 sps:$4 sm:$0xff]   ;;  %v1807_v28 = vld [vmem:[%s2569_s1 + $0x164] ss:$8 sps:$4 sm:$0xff]   ;;  %v1810_v32 = vld [vmem:[%s2569_s1 + $0x160] ss:$8 sps:$4 sm:$0xff]  }
   0x9   :  { %492 = vmatpush1.bf16.msra.mxu0 %v1792_v8  ;;  %v1828_v29 = vld [vmem:[%s2569_s1 + $0xb0] ss:$8 sps:$4 sm:$0xff]   ;;  %v1829_v30 = vld [vmem:[%s2569_s1 + $0xc4] ss:$8 sps:$4 sm:$0xff]   ;;  %v1813_v33 = vld [vmem:[%s2569_s1 + $0x174] ss:$8 sps:$4 sm:$0xff]  }
   0xa   :  { %1771 = vset.pattern.permute.xlu1 %v1994_v12  ;;  %1770 = vset.pattern.permute.xlu0 %v1994_v12  ;;  %v1834_v34 = vld [vmem:[%s2569_s1 + $0xc0] ss:$8 sps:$4 sm:$0xff]   ;;  %v1835_v35 = vld [vmem:[%s2569_s1 + $0xd4] ss:$8 sps:$4 sm:$0xff]   ;;  %v1816_v36 = vld [vmem:[%s2569_s1 + $0x170] ss:$8 sps:$4 sm:$0xff]  }
   0xb   :  { %540 = vperm.xlu1 %1771, %v2079_v3   ;;  %537 = vperm.xlu0 %1770, %v2072_v0   ;;  %v1821_v37 = vld [vmem:[%s2569_s1 + $0x184] ss:$8 sps:$4 sm:$0xff]   ;;  %v1840_v38 = vld [vmem:[%s2569_s1 + $0xd0] ss:$8 sps:$4 sm:$0xff]   ;;  %v1999_v40 = vmov 6   ;;  %v2000_v43 = vmov 10  }
   0xc   :  { %493 = vmatprep.subr.bf16.mxu0 %v1793_v9  ;;  %206 = vmatpush1.bf16.msra.mxu1 %v1815_v18  ;;  %v1841_v39 = vld [vmem:[%s2569_s1 + $0xe4] ss:$8 sps:$4 sm:$0xff]   ;;  %v1846_v41 = vld [vmem:[%s2569_s1 + $0xe0] ss:$8 sps:$4 sm:$0xff]   ;;  %v1847_v42 = vld [vmem:[%s2569_s1 + $0xf4] ss:$8 sps:$4 sm:$0xff]  }
   0xd   :  { %494 = vmatpush1.bf16.msra.mxu0 %v1795_v10  ;;  %207 = vmatprep.subr.bf16.mxu1 %v1817_v20  ;;  %v2001_v44 = vmov 11   ;;  %v1852_v45 = vld [vmem:[%s2569_s1 + $0xf0] ss:$8 sps:$4 sm:$0xff]   ;;  %v1855_v46 = vld [vmem:[%s2569_s1 + $0x4] ss:$8 sps:$4 sm:$0xff]   ;;  %v2002_v47 = vmov 5  }
   0xe   :  { %495 = vmatprep.subr.bf16.mxu0 %v1796_v11 }
   0xf   :  { %1772 = vset.pattern.permute.xlu1 %v1995_v19  ;;  %1773 = vset.pattern.permute.xlu0 %v1995_v19 }
  0x10   :  { %545 = vperm.xlu1 %1772, %v2072_v0   ;;  %548 = vperm.xlu0 %1773, %v2079_v3  }
  0x11   :  { %496 = vmatpush1.bf16.msra.mxu0 %v1798_v14  ;;  %208 = vmatpush1.bf16.msra.mxu1 %v1822_v23 }
  0x12   :  { %497 = vmatprep.subr.bf16.mxu0 %v1799_v17  ;;  %209 = vmatprep.subr.bf16.mxu1 %v1823_v24 }
  0x14   :  { %1774 = vset.pattern.permute.xlu1 %v1996_v25  ;;  %1775 = vset.pattern.permute.xlu0 %v1997_v26 }
  0x15   :  { %84 = vperm.xlu1 %1774, %v2072_v0   ;;  %92 = vperm.xlu0 %1775, %v2072_v0  }
  0x16   :  { %498 = vmatpush1.bf16.msra.mxu0 %v1801_v21  ;;  %210 = vmatpush1.bf16.msra.mxu1 %v1828_v29 }
  0x17   :  { %499 = vmatprep.subr.bf16.mxu0 %v1802_v22  ;;  %211 = vmatprep.subr.bf16.mxu1 %v1829_v30 }
  0x19   :  { %87 = vperm.xlu1 %1774, %v2079_v3   ;;  %1778 = vset.pattern.permute.xlu0 %v1998_v31 }
  0x1a   :  { %707 = vperm.xlu0 %1778, %v2079_v3   ;;  %500 = vmatpush1.bf16.msra.mxu0 %v1804_v27 }
  0x1b   :  { %501 = vmatprep.subr.bf16.mxu0 %v1807_v28  ;;  %212 = vmatpush1.bf16.msra.mxu1 %v1834_v34 }
  0x1c   :  { %213 = vmatprep.subr.bf16.mxu1 %v1835_v35 }
  0x1d   :  { %1776 = vset.pattern.permute.xlu1 %v1997_v26 }
  0x1e   :  { %95 = vperm.xlu1 %1776, %v2079_v3   ;;  %1780 = vset.pattern.permute.xlu0 %v1993_v6 }
  0x1f   :  { %45 = vperm.xlu0 %1780, %v2072_v0   ;;  %502 = vmatpush1.bf16.msra.mxu0 %v1810_v32 }
  0x20   :  { %503 = vmatprep.subr.bf16.mxu0 %v1813_v33  ;;  %214 = vmatpush1.bf16.msra.mxu1 %v1840_v38 }
  0x21   :  { %215 = vmatprep.subr.bf16.mxu1 %v1841_v39 }
  0x22   :  { %1777 = vset.pattern.permute.xlu1 %v1998_v31 }
  0x23   :  { %704 = vperm.xlu1 %1777, %v2072_v0   ;;  %1783 = vset.pattern.permute.xlu0 %v1999_v40 }
  0x24   :  { %56 = vperm.xlu0 %1783, %v2079_v3   ;;  %504 = vmatpush1.bf16.msra.mxu0 %v1816_v36 }
  0x25   :  { %656 = vmatprep.subr.bf16.mxu0 %v1821_v37  ;;  %216 = vmatpush1.bf16.msra.mxu1 %v1846_v41 }
  0x26   :  { %217 = vmatprep.subr.bf16.mxu1 %v1847_v42 }
  0x27   :  { %1779 = vset.pattern.permute.xlu1 %v2000_v43 }
  0x28   :  { %712 = vperm.xlu1 %1779, %v2072_v0   ;;  %1785 = vset.pattern.permute.xlu0 %v2001_v44 }
  0x29   :  { %879 = vperm.xlu0 %1785, %v2072_v0   ;;  %218 = vmatpush1.bf16.msra.mxu1 %v1852_v45 }
  0x2a   :  { %326 = vmatprep.subr.bf16.mxu1 %v1855_v46 }
  0x2c   :  { %715 = vperm.xlu1 %1779, %v2079_v3  }
  0x30   :  { %1781 = vset.pattern.permute.xlu1 %v1993_v6 }
  0x31   :  { %48 = vperm.xlu1 %1781, %v2079_v3  }
  0x35   :  { %1782 = vset.pattern.permute.xlu1 %v1999_v40 }
  0x36   :  { %53 = vperm.xlu1 %1782, %v2072_v0  }
  0x3a   :  { %1784 = vset.pattern.permute.xlu1 %v2002_v47 }
  0x3b   :  { %871 = vperm.xlu1 %1784, %v2072_v0  }
  0x3f   :  { %874 = vperm.xlu1 %1784, %v2079_v3  }
  0x43   :  { %1786 = vset.pattern.permute.xlu1 %v2001_v44 }
  0x44   :  { %882 = vperm.xlu1 %1786, %v2079_v3  }
  0x45   :  { %16 = vsyncpa [#allocation3], 0  ;;  %v42_v48 = vlaneseq  ;;  %v1819_v54 = vld [vmem:[%s2569_s1 + $0x180] ss:$8 sps:$4 sm:$0xff]   ;;  %v1827_v55 = vld [vmem:[%s2569_s1 + $0x194] ss:$8 sps:$4 sm:$0xff]  }
  0x46   :  { %v2003_v56 = vmov 1.0|1.0   ;;  %v1825_v57 = vld [vmem:[%s2569_s1 + $0x190] ss:$8 sps:$4 sm:$0xff]   ;;  %v1833_v59 = vld [vmem:[%s2569_s1 + $0x1a4] ss:$8 sps:$4 sm:$0xff]  }
  0x47   :  { %v2210_v49 = vand.u32 127, %v42_v48  ;;  %v1831_v61 = vld [vmem:[%s2569_s1 + $0x1a0] ss:$8 sps:$4 sm:$0xff]   ;;  %v1839_v63 = vld [vmem:[%s2569_s1 + $0x1b4] ss:$8 sps:$4 sm:$0xff]  }
  0x48   :  { %v1837_v1 = vld [vmem:[%s2569_s1 + $0x1b0] ss:$8 sps:$4 sm:$0xff]   ;;  %v1845_v2 = vld [vmem:[%s2569_s1 + $0x1c4] ss:$8 sps:$4 sm:$0xff]   ;;  %v1843_v4 = vld [vmem:[%s2569_s1 + $0x1c0] ss:$8 sps:$4 sm:$0xff]  }
  0x49   :  { %v1851_v5 = vld [vmem:[%s2569_s1 + $0x1d4] ss:$8 sps:$4 sm:$0xff]   ;;  %v1849_v9 = vld [vmem:[%s2569_s1 + $0x1d0] ss:$8 sps:$4 sm:$0xff]   ;;  %v1858_v10 = vld [vmem:[%s2569_s1 + $0x1e4] ss:$8 sps:$4 sm:$0xff]  }
  0x4a   :  { %v1853_v12 = vld [vmem:[%s2569_s1] ss:$8 sps:$4 sm:$0xff]   ;;  %v1861_v14 = vld [vmem:[%s2569_s1 + $0x14] ss:$8 sps:$4 sm:$0xff]   ;;  %v1859_v16 = vld [vmem:[%s2569_s1 + $0x10] ss:$8 sps:$4 sm:$0xff]  }
  0x4b   :  { %v1856_v13 = vld [vmem:[%s2569_s1 + $0x1e0] ss:$8 sps:$4 sm:$0xff]   ;;  %v1864_v15 = vld [vmem:[%s2569_s1 + $0x1f4] ss:$8 sps:$4 sm:$0xff]   ;;  %v1862_v17 = vld [vmem:[%s2569_s1 + $0x1f0] ss:$8 sps:$4 sm:$0xff]  }
  0x4c   :  { %v1867_v19 = vld [vmem:[%s2569_s1 + $0x24] ss:$8 sps:$4 sm:$0xff]   ;;  %v1865_v21 = vld [vmem:[%s2569_s1 + $0x20] ss:$8 sps:$4 sm:$0xff]   ;;  %v1873_v23 = vld [vmem:[%s2569_s1 + $0x34] ss:$8 sps:$4 sm:$0xff]  }
  0x4d   :  { %v1870_v20 = vld [vmem:[%s2569_s1 + $0x204] ss:$8 sps:$4 sm:$0xff]   ;;  %v1868_v22 = vld [vmem:[%s2569_s1 + $0x200] ss:$8 sps:$4 sm:$0xff]   ;;  %v1876_v24 = vld [vmem:[%s2569_s1 + $0x214] ss:$8 sps:$4 sm:$0xff]  }
  0x4e   :  { %v1871_v27 = vld [vmem:[%s2569_s1 + $0x30] ss:$8 sps:$4 sm:$0xff]   ;;  %v1879_v29 = vld [vmem:[%s2569_s1 + $0x44] ss:$8 sps:$4 sm:$0xff]   ;;  %v1877_v32 = vld [vmem:[%s2569_s1 + $0x40] ss:$8 sps:$4 sm:$0xff]  }
  0x4f   :  { %v1874_v28 = vld [vmem:[%s2569_s1 + $0x210] ss:$8 sps:$4 sm:$0xff]   ;;  %v1882_v30 = vld [vmem:[%s2569_s1 + $0x224] ss:$8 sps:$4 sm:$0xff]   ;;  %v1880_v33 = vld [vmem:[%s2569_s1 + $0x220] ss:$8 sps:$4 sm:$0xff]  }
  0x50   :  { %v1885_v35 = vld [vmem:[%s2569_s1 + $0x54] ss:$8 sps:$4 sm:$0xff]   ;;  %v1883_v38 = vld [vmem:[%s2569_s1 + $0x50] ss:$8 sps:$4 sm:$0xff]   ;;  %v1891_v40 = vld [vmem:[%s2569_s1 + $0x64] ss:$8 sps:$4 sm:$0xff]  }
  0x51   :  { %v1888_v36 = vld [vmem:[%s2569_s1 + $0x234] ss:$8 sps:$4 sm:$0xff]   ;;  %v1886_v39 = vld [vmem:[%s2569_s1 + $0x230] ss:$8 sps:$4 sm:$0xff]   ;;  %v1894_v41 = vld [vmem:[%s2569_s1 + $0x244] ss:$8 sps:$4 sm:$0xff]  }
  0x52   :  { %v1889_v44 = vld [vmem:[%s2569_s1 + $0x60] ss:$8 sps:$4 sm:$0xff]   ;;  %v1897_v46 = vld [vmem:[%s2569_s1 + $0x74] ss:$8 sps:$4 sm:$0xff]  }
  0x53   :  { %v1892_v45 = vld [vmem:[%s2569_s1 + $0x240] ss:$8 sps:$4 sm:$0xff]   ;;  %v1900_v47 = vld [vmem:[%s2569_s1 + $0x254] ss:$8 sps:$4 sm:$0xff]  }
  0x81   :  { %v379_v50 = vpop.permute.xlu1 %378  ;;  %v371_v51 = vpop.permute.xlu0 %370 }
  0x82   :  { %vm383_vm0 = vcmp.eq.s32.totalorder %v2210_v49, %v379_v50  ;;  %vm375_vm1 = vcmp.eq.s32.totalorder %v2210_v49, %v371_v51  ;;  %v1895_v50 = vld [vmem:[%s2569_s1 + $0x70] ss:$8 sps:$4 sm:$0xff]  }
  0x83   :  { %vm385_vm2 = vmor %vm375_vm1, %vm383_vm0  ;;  %v1898_v51 = vld [vmem:[%s2569_s1 + $0x250] ss:$8 sps:$4 sm:$0xff]  }
  0x85   :  { %v382_v52 = vpop.permute.xlu1 %381  ;;  %v374_v53 = vpop.permute.xlu0 %373 }
  0x86   :  { %vm384_vm3 = vcmp.eq.s32.totalorder %v2210_v49, %v382_v52  ;;  %vm376_vm4 = vcmp.eq.s32.totalorder %v2210_v49, %v374_v53  ;;  %v1903_v52 = vld [vmem:[%s2569_s1 + $0x264] ss:$8 sps:$4 sm:$0xff]   ;;  %v1901_v53 = vld [vmem:[%s2569_s1 + $0x260] ss:$8 sps:$4 sm:$0xff]  }
  0x87   :  { %vm386_vm5 = vmor %vm376_vm4, %vm384_vm3 }
  0x88   :  { %vm1568_vm6 = vmpackc.low %vm386_vm5, %vm385_vm2 }
  0x89   :  { %1569 = vmatmul.mubr.msk.bf16.vlgmr.msra.gmra.mrb[0].mxu0 %vm1568_vm6, %v2003_v56 }
  0x8a   :  { %657 = vmatpush1.bf16.msra.mxu0 %v1819_v54  ;;  %v541_v58 = vpop.permute.xlu1 %540  ;;  %688 = vmatprep.mubr.bf16.mxu0 %v1993_v6  ;;  %v538_v60 = vpop.permute.xlu0 %537  ;;  %v1906_v54 = vld [vmem:[%s2569_s1 + $0x274] ss:$8 sps:$4 sm:$0xff]  }
  0x8b   :  { %658 = vmatprep.subr.bf16.mxu0 %v1827_v55  ;;  %vm542_vm15 = vcmp.eq.s32.totalorder %v2210_v49, %v538_v60  ;;  %vm543_vm0 = vcmp.eq.s32.totalorder %v2210_v49, %v541_v58  ;;  %v1904_v55 = vld [vmem:[%s2569_s1 + $0x270] ss:$8 sps:$4 sm:$0xff]   ;;  %v1907_v58 = vld [vmem:[%s2569_s1 + $0x280] ss:$8 sps:$4 sm:$0xff]  }
  0x8c   :  { %v1910_v60 = vld [vmem:[%s2569_s1 + $0x290] ss:$8 sps:$4 sm:$0xff]  }
  0x8e   :  { %659 = vmatpush1.bf16.msra.mxu0 %v1825_v57  ;;  %v1909_v57 = vld [vmem:[%s2569_s1 + $0x284] ss:$8 sps:$4 sm:$0xff]  }
  0x8f   :  { %660 = vmatprep.subr.bf16.mxu0 %v1833_v59  ;;  %v546_v62 = vpop.permute.xlu1 %545  ;;  %v549_v0 = vpop.permute.xlu0 %548  ;;  %v1912_v59 = vld [vmem:[%s2569_s1 + $0x294] ss:$8 sps:$4 sm:$0xff]  }
  0x90   :  { %vm550_vm14 = vcmp.eq.s32.totalorder %v2210_v49, %v546_v62  ;;  %vm551_vm1 = vcmp.eq.s32.totalorder %v2210_v49, %v549_v0  ;;  %v1913_v62 = vld [vmem:[%s2569_s1 + $0x2a0] ss:$8 sps:$4 sm:$0xff]   ;;  %v1916_v0 = vld [vmem:[%s2569_s1 + $0x2b0] ss:$8 sps:$4 sm:$0xff]  }
  0x91   :  { %vm552_vm2 = vmor %vm542_vm15, %vm550_vm14 }
  0x92   :  { %661 = vmatpush1.bf16.msra.mxu0 %v1831_v61  ;;  %vm553_vm3 = vmor %vm543_vm0, %vm551_vm1  ;;  %v1915_v61 = vld [vmem:[%s2569_s1 + $0x2a4] ss:$8 sps:$4 sm:$0xff]  }
  0x93   :  { %662 = vmatprep.subr.bf16.mxu0 %v1839_v63  ;;  %vm1604_vm4 = vmpackc.low %vm553_vm3, %vm552_vm2  ;;  %v1918_v63 = vld [vmem:[%s2569_s1 + $0x2b4] ss:$8 sps:$4 sm:$0xff]  }
  0x94   :  { %v85_v3 = vpop.permute.xlu1 %84  ;;  %v93_v7 = vpop.permute.xlu0 %92 }
  0x95   :  { %vm89_vm7 = vcmp.eq.s32.totalorder %v2210_v49, %v85_v3  ;;  %vm97_vm8 = vcmp.eq.s32.totalorder %v2210_v49, %v93_v7  ;;  %v1919_v3 = vld [vmem:[%s2569_s1 + $0x2c0] ss:$8 sps:$4 sm:$0xff]   ;;  %v1922_v7 = vld [vmem:[%s2569_s1 + $0x2d0] ss:$8 sps:$4 sm:$0xff]  }
  0x96   :  { %663 = vmatpush1.bf16.msra.mxu0 %v1837_v1  ;;  %vm99_vm10 = vmor %vm89_vm7, %vm97_vm8 }
  0x97   :  { %664 = vmatprep.subr.bf16.mxu0 %v1845_v2  ;;  %v1921_v2 = vld [vmem:[%s2569_s1 + $0x2c4] ss:$8 sps:$4 sm:$0xff]  }
  0x98   :  { %v88_v8 = vpop.permute.xlu1 %87 }
  0x99   :  { %vm90_vm9 = vcmp.eq.s32.totalorder %v2210_v49, %v88_v8  ;;  %v2304_v26 = vpop.permute.xlu0 %707  ;;  %v1927_v8 = vld [vmem:[%s2569_s1 + $0x2e4] ss:$8 sps:$4 sm:$0xff]  }
  0x9a   :  { %665 = vmatpush1.bf16.msra.mxu0 %v1843_v4  ;;  %vm710_vm15 = vcmp.eq.s32.totalorder %v2210_v49, %v2304_v26  ;;  %v1924_v4 = vld [vmem:[%s2569_s1 + $0x2d4] ss:$8 sps:$4 sm:$0xff]  }
  0x9b   :  { %666 = vmatprep.subr.bf16.mxu0 %v1851_v5 }
  0x9d   :  { %v96_v11 = vpop.permute.xlu1 %95 }
  0x9e   :  { %vm98_vm11 = vcmp.eq.s32.totalorder %v2210_v49, %v96_v11  ;;  %667 = vmatpush1.bf16.msra.mxu0 %v1849_v9  ;;  %v46_v34 = vpop.permute.xlu0 %45 }
  0x9f   :  { %vm100_vm12 = vmor %vm90_vm9, %vm98_vm11  ;;  %668 = vmatprep.subr.bf16.mxu0 %v1858_v10  ;;  %vm50_vm7 = vcmp.eq.s32.totalorder %v2210_v49, %v46_v34  ;;  %v1925_v10 = vld [vmem:[%s2569_s1 + $0x2e0] ss:$8 sps:$4 sm:$0xff]  }
  0xa0   :  { %vm1514_vm13 = vmpackc.low %vm100_vm12, %vm99_vm10 }
  0xa1   :  { %1515 = vmatmul.mubr.msk.bf16.vlgmr.msra.gmra.mrb[0].mxu1 %vm1514_vm13, %v2003_v56 }
  0xa2   :  { %327 = vmatpush1.bf16.msra.mxu1 %v1853_v12  ;;  %669 = vmatpush1.bf16.msra.mxu0 %v1856_v13  ;;  %v2281_v18 = vpop.permute.xlu1 %704  ;;  %v1930_v12 = vld [vmem:[%s2569_s1 + $0x2f4] ss:$8 sps:$4 sm:$0xff]   ;;  %v1928_v13 = vld [vmem:[%s2569_s1 + $0x2f0] ss:$8 sps:$4 sm:$0xff]  }
  0xa3   :  { %328 = vmatprep.subr.bf16.mxu1 %v1861_v14  ;;  %670 = vmatprep.subr.bf16.mxu0 %v1864_v15  ;;  %v57_v42 = vpop.permute.xlu0 %56  ;;  %vm709_vm12 = vcmp.eq.s32.totalorder %v2210_v49, %v2281_v18  ;;  %v1040_v18 = vshrl.u32 %v42_v48, 7 }
  0xa4   :  { %358 = vmatprep.mubr.bf16.mxu1 %v1993_v6  ;;  %vm59_vm6 = vcmp.eq.s32.totalorder %v2210_v49, %v57_v42  ;;  %v1936_v42 = vld [vmem:[%s2573_s5 + $0x28] sm:$0xff]  }
  0xa6   :  { %329 = vmatpush1.bf16.msra.mxu1 %v1859_v16  ;;  %671 = vmatpush1.bf16.msra.mxu0 %v1862_v17 }
  0xa7   :  { %330 = vmatprep.subr.bf16.mxu1 %v1867_v19  ;;  %823 = vmatprep.subr.bf16.mxu0 %v1870_v20  ;;  %v2302_v25 = vpop.permute.xlu1 %712  ;;  %v2443_v19 = vsub.s32 1, %v1040_v18  ;;  %v2448_v20 = vsub.s32 0, %v1040_v18 }
  0xa8   :  { %vm717_vm13 = vcmp.eq.s32.totalorder %v2210_v49, %v2302_v25  ;;  %v880_v9 = vpop.permute.xlu0 %879 }
  0xa9   :  { %1605 = vmatmul.mubr.msk.bf16.vlgmr.msra.gmra.mrb[0].mxu0 %vm1604_vm4, %v2003_v56  ;;  %vm719_vm0 = vmor %vm709_vm12, %vm717_vm13  ;;  %vm884_vm4 = vcmp.eq.s32.totalorder %v2210_v49, %v880_v9  ;;  %vm1286_vm12 = vcmask 818176   ;;  %vm1395_vm13 = vcmask 1041408  }
  0xaa   :  { %331 = vmatpush1.bf16.msra.mxu1 %v1865_v21  ;;  %824 = vmatpush1.bf16.msra.mxu0 %v1868_v22 }
  0xab   :  { %332 = vmatprep.subr.bf16.mxu1 %v1873_v23  ;;  %825 = vmatprep.subr.bf16.mxu0 %v1876_v24  ;;  %v716_v31 = vpop.permute.xlu1 %715 }
  0xac   :  { %855 = vmatprep.mubr.bf16.mxu0 %v1993_v6  ;;  %vm718_vm14 = vcmp.eq.s32.totalorder %v2210_v49, %v716_v31 }
  0xad   :  { %vm720_vm1 = vmor %vm710_vm15, %vm718_vm14  ;;  %vm2005_vm14 = vmmov 0  }
  0xae   :  { %333 = vmatpush1.bf16.msra.mxu1 %v1871_v27  ;;  %826 = vmatpush1.bf16.msra.mxu0 %v1874_v28  ;;  %vm1640_vm2 = vmpackc.low %vm720_vm1, %vm719_vm0 }
  0xaf   :  { %334 = vmatprep.subr.bf16.mxu1 %v1879_v29  ;;  %827 = vmatprep.subr.bf16.mxu0 %v1882_v30 }
  0xb0   :  { %v49_v37 = vpop.permute.xlu1 %48 }
  0xb1   :  { %vm51_vm5 = vcmp.eq.s32.totalorder %v2210_v49, %v49_v37  ;;  %v1931_v37 = vld [vmem:[%s2573_s5] sm:$0xff]  }
  0xb2   :  { %335 = vmatpush1.bf16.msra.mxu1 %v1877_v32  ;;  %828 = vmatpush1.bf16.msra.mxu0 %v1880_v33  ;;  %vm61_vm9 = vmor %vm51_vm5, %vm59_vm6 }
  0xb3   :  { %336 = vmatprep.subr.bf16.mxu1 %v1885_v35  ;;  %829 = vmatprep.subr.bf16.mxu0 %v1888_v36 }
  0xb5   :  { %v54_v43 = vpop.permute.xlu1 %53 }
  0xb6   :  { %337 = vmatpush1.bf16.msra.mxu1 %v1883_v38  ;;  %830 = vmatpush1.bf16.msra.mxu0 %v1886_v39  ;;  %vm58_vm8 = vcmp.eq.s32.totalorder %v2210_v49, %v54_v43  ;;  %v1932_v38 = vld [vmem:[%s2573_s5 + $0x8] sm:$0xff]   ;;  %v1933_v39 = vld [vmem:[%s2573_s5 + $0x10] sm:$0xff]  }
  0xb7   :  { %338 = vmatprep.subr.bf16.mxu1 %v1891_v40  ;;  %831 = vmatprep.subr.bf16.mxu0 %v1894_v41  ;;  %vm60_vm10 = vmor %vm50_vm7, %vm58_vm8  ;;  %v1934_v40 = vld [vmem:[%s2573_s5 + $0x18] sm:$0xff]   ;;  %v1935_v41 = vld [vmem:[%s2573_s5 + $0x20] sm:$0xff]  }
  0xb8   :  { %vm1532_vm11 = vmpackc.low %vm61_vm9, %vm60_vm10  ;;  %vm1055_vm10 = vcmask 588800  }
  0xba   :  { %339 = vmatpush1.bf16.msra.mxu1 %v1889_v44  ;;  %832 = vmatpush1.bf16.msra.mxu0 %v1892_v45  ;;  %v872_v1 = vpop.permute.xlu1 %871 }
  0xbb   :  { %340 = vmatprep.subr.bf16.mxu1 %v1897_v46  ;;  %833 = vmatprep.subr.bf16.mxu0 %v1900_v47  ;;  %vm876_vm3 = vcmp.eq.s32.totalorder %v2210_v49, %v872_v1  ;;  %v1940_v1 = vld [vmem:[%s2573_s5 + $0x48] sm:$0xff]  }
  0xbc   :  { %vm886_vm7 = vmor %vm876_vm3, %vm884_vm4 }
  0xbe   :  { %341 = vmatpush1.bf16.msra.mxu1 %v1895_v50  ;;  %834 = vmatpush1.bf16.msra.mxu0 %v1898_v51  ;;  %v875_v5 = vpop.permute.xlu1 %874 }
  0xbf   :  { %835 = vmatprep.subr.bf16.mxu0 %v1903_v52  ;;  %1243 = vmatprep.subr.bf16.mxu1 %v1993_v6  ;;  %vm877_vm5 = vcmp.eq.s32.totalorder %v2210_v49, %v875_v5 }
  0xc1   :  { %1533 = vmatmul.mubr.msk.bf16.vlgmr.msra.gmra.mrb[0].mxu1 %vm1532_vm11, %v2003_v56  ;;  %vm1239_vm11 = vcmask 1043456  }
  0xc2   :  { %836 = vmatpush1.bf16.msra.mxu0 %v1901_v53  ;;  %1244 = vmatpush1.bf16.msra.mxu1 %v1931_v37 }
  0xc3   :  { %837 = vmatprep.subr.bf16.mxu0 %v1906_v54  ;;  %v883_v11 = vpop.permute.xlu1 %882  ;;  %1245 = vmatprep.subr.bf16.mxu1 %v1993_v6 }
  0xc4   :  { %vm885_vm6 = vcmp.eq.s32.totalorder %v2210_v49, %v883_v11  ;;  %v1037_v49 = vld [vmem:[%s2570_s2] sm:$0x3] }
  0xc5   :  { %vm887_vm8 = vmor %vm877_vm5, %vm885_vm6  ;;  %v1046_v22 = vrot.slane %v1037_v49, %v2443_v19 }
  0xc6   :  { %838 = vmatpush1.bf16.msra.mxu0 %v1904_v55  ;;  %vm1676_vm9 = vmpackc.low %vm887_vm8, %vm886_vm7  ;;  %1246 = vmatpush1.bf16.msra.mxu1 %v1932_v38 }
  0xc7   :  { %990 = vmatprep.subr.bf16.mxu0 %v1909_v57  ;;  %1247 = vmatprep.subr.bf16.mxu1 %v1993_v6 }
  0xc9   :  { %1641 = vmatmul.mubr.msk.bf16.vlgmr.msra.gmra.mrb[0].mxu0 %vm1640_vm2, %v2003_v56 }
  0xca   :  { %991 = vmatpush1.bf16.msra.mxu0 %v1907_v58  ;;  %1022 = vmatprep.mubr.bf16.mxu0 %v1993_v6 }
  0xcb   :  { %992 = vmatprep.subr.bf16.mxu0 %v1912_v59  ;;  %1248 = vmatpush1.bf16.msra.mxu1 %v1933_v39 }
  0xcc   :  { %1249 = vmatprep.subr.bf16.mxu1 %v1993_v6 }
  0xce   :  { %993 = vmatpush1.bf16.msra.mxu0 %v1910_v60 }
  0xcf   :  { %994 = vmatprep.subr.bf16.mxu0 %v1915_v61  ;;  %1250 = vmatpush1.bf16.msra.mxu1 %v1934_v40 }
  0xd0   :  { %1251 = vmatprep.subr.bf16.mxu1 %v1993_v6 }
  0xd2   :  { %995 = vmatpush1.bf16.msra.mxu0 %v1913_v62  ;;  %v1937_v62 = vld [vmem:[%s2573_s5 + $0x30] sm:$0xff]  }
  0xd3   :  { %996 = vmatprep.subr.bf16.mxu0 %v1918_v63  ;;  %1252 = vmatpush1.bf16.msra.mxu1 %v1935_v41  ;;  %v1938_v63 = vld [vmem:[%s2573_s5 + $0x38] sm:$0xff]  }
  0xd4   :  { %1253 = vmatprep.subr.bf16.mxu1 %v1993_v6 }
  0xd6   :  { %997 = vmatpush1.bf16.msra.mxu0 %v1916_v0  ;;  %v1939_v0 = vld [vmem:[%s2573_s5 + $0x40] sm:$0xff]  }
  0xd7   :  { %998 = vmatprep.subr.bf16.mxu0 %v1921_v2  ;;  %1254 = vmatpush1.bf16.msra.mxu1 %v1936_v42  ;;  %v1941_v2 = vld [vmem:[%s2573_s5 + $0x50] sm:$0xff]  }
  0xd8   :  { %1255 = vmatprep.subr.bf16.mxu1 %v1993_v6 }
  0xda   :  { %999 = vmatpush1.bf16.msra.mxu0 %v1919_v3  ;;  %v1942_v3 = vld [vmem:[%s2573_s5 + $0x58] sm:$0xff]  }
  0xdb   :  { %1000 = vmatprep.subr.bf16.mxu0 %v1924_v4  ;;  %1256 = vmatpush1.bf16.msra.mxu1 %v1937_v62  ;;  %v1943_v4 = vld [vmem:[%s2573_s5 + $0x60] ss:$0 sps:$4 sm:$0xff]  }
  0xdc   :  { %1257 = vmatprep.subr.bf16.mxu1 %v1993_v6  ;;  %v1241_v5 = vsel %vm1239_vm11, %v1943_v4, 0  ;;  %v1948_v62 = vld [vmem:[%s2577_s9 + $0x20] sm:$0xff]  }
  0xde   :  { %1001 = vmatpush1.bf16.msra.mxu0 %v1922_v7 }
  0xdf   :  { %1002 = vmatprep.subr.bf16.mxu0 %v1927_v8  ;;  %1258 = vmatpush1.bf16.msra.mxu1 %v1938_v63  ;;  %v1949_v63 = vld [vmem:[%s2577_s9 + $0x28] sm:$0xff]  }
  0xe0   :  { %1259 = vmatprep.subr.bf16.mxu1 %v1993_v6 }
  0xe2   :  { %1003 = vmatpush1.bf16.msra.mxu0 %v1925_v10 }
  0xe3   :  { %1004 = vmatprep.subr.bf16.mxu0 %v1930_v12  ;;  %1260 = vmatpush1.bf16.msra.mxu1 %v1939_v0  ;;  %v1950_v0 = vld [vmem:[%s2577_s9 + $0x30] ss:$0 sps:$4 sm:$0x33]  }
  0xe4   :  { %1261 = vmatprep.subr.bf16.mxu1 %v1993_v6 }
  0xe6   :  { %1005 = vmatpush1.bf16.msra.mxu0 %v1928_v13  ;;  %v1053_v13 = vld [vmem:[%s2571_s3] sm:$0x3] }
  0xe7   :  { %1262 = vmatpush1.bf16.msra.mxu1 %v1940_v1  ;;  %v1397_v1 = vsel %vm1395_vm13, %v1950_v0, 0 }
  0xe8   :  { %1263 = vmatprep.subr.bf16.mxu1 %v1993_v6 }
  0xe9   :  { %1677 = vmatmul.mubr.msk.bf16.vlgmr.msra.gmra.mrb[0].mxu0 %vm1676_vm9, %v2003_v56  ;;  %v1042_v56 = vrot.slane %v1037_v49, %v2448_v20 }
  0xeb   :  { %1264 = vmatpush1.bf16.msra.mxu1 %v1941_v2 }
  0xec   :  { %1265 = vmatprep.subr.bf16.mxu1 %v1993_v6 }
  0xef   :  { %1266 = vmatpush1.bf16.msra.mxu1 %v1942_v3 }
  0xf0   :  { %1267 = vmatprep.subr.bf16.mxu1 %v1993_v6  ;;  %v1097_v6 = vrot.slane %v1053_v13, %v2448_v20 }
  0xf3   :  { %1268 = vmatpush1.bf16.msra.mxu1 %v1241_v5 }
 0x194   :  { %v360_v14 = vpop.f32.mrb[0].mxu1 }
 0x195   :  { %v362_v15 = vpop.f32.mrb[1].mxu1 }
 0x196   :  { %v364_v16 = vpop.f32.mrb[2].mxu1 }
 0x197   :  { %v366_v17 = vpop.f32.mrb[3].mxu1 }
 0x1bc   :  { %v1024_v21 = vpop.f32.mrb[0].mxu0 }
 0x1bd   :  { %v1730_v23 = vadd.f32 %v1024_v21, %v360_v14  ;;  %v1026_v24 = vpop.f32.mrb[1].mxu0  ;;  %v1054_v14 = vld [vmem:[%s2572_s4] sm:$0x3] }
 0x1be   :  { %v1731_v25 = vadd.f32 %v1026_v24, %v362_v15  ;;  %v1028_v26 = vpop.f32.mrb[2].mxu0  ;;  %v1101_v15 = vrot.slane %v1053_v13, %v2443_v19  ;;  %v1116_v49 = vrot.slane %v1054_v14, %v2443_v19  ;;  %v1112_v21 = vrot.slane %v1054_v14, %v2448_v20  ;;  %v1678_v19 = vld [vmem:[%s2574_s6] ss:$0 sm:$0xff] }
 0x1bf   :  { %v1732_v27 = vadd.f32 %v1028_v26, %v364_v16  ;;  %v1030_v28 = vpop.f32.mrb[3].mxu0  ;;  %v1049_v30 = vadd.f32 %v1730_v23, %v1042_v56  ;;  %v1694_v13 = vld [vmem:[%s2576_s8] ss:$0 sm:$0xff] }
 0x1c0   :  { %v1050_v48 = vadd.f32 %v1731_v25, %v1046_v22  ;;  %v1733_v29 = vadd.f32 %v1030_v28, %v366_v17 }
 0x1c1   :  { %v1051_v33 = vadd.f32 %v1732_v27, %v1042_v56 }
 0x1c2   :  { %v1052_v31 = vadd.f32 %v1733_v29, %v1046_v22  ;;  %v1056_v32 = vsel %vm1055_vm10, %v1050_v48, 0.0 }
 0x1c3   :  { %v1057_v34 = vadd.f32 %v1056_v32, %v1049_v30 }
 0x1c4   :  { %v1060_v35 = vsel %vm1055_vm10, %v1052_v31, 0.0 }
 0x1c5   :  { %1058 = vadd.xlane.f32.xlu1 %v1057_v34  ;;  %v1061_v36 = vadd.f32 %v1060_v35, %v1051_v33 }
 0x1c7   :  { %1062 = vadd.xlane.f32.xlu0 %v1061_v36 }
 0x252   :  { %v1059_v43 = vpop.xlane.xlu1 %1058 }
 0x253   :  { %v1065_v44 = vmul.f32 0.005, %v1059_v43 }
 0x254   :  { %v1063_v45 = vpop.xlane.xlu0 %1062 }
 0x255   :  { %v1067_v46 = vsub.f32 %v1049_v30, %v1065_v44  ;;  %v1068_v47 = vsub.f32 %v1050_v48, %v1065_v44  ;;  %v1066_v50 = vmul.f32 0.005, %v1063_v45  ;;  %v2004_v44 = vmov 0.0  }
 0x256   :  { %1712 = vmatprep.subr.bf16.mxu1 %v2004_v44 }
 0x257   :  { %v1069_v51 = vsub.f32 %v1051_v33, %v1066_v50  ;;  %v1070_v52 = vsub.f32 %v1052_v31, %v1066_v50  ;;  %v1071_v53 = vmul.f32 %v1067_v46, %v1067_v46  ;;  %v1072_v54 = vmul.f32 %v1068_v47, %v1068_v47 }
 0x259   :  { %v1075_v55 = vsel %vm1055_vm10, %v1072_v54, 0.0  ;;  %v1073_v57 = vmul.f32 %v1069_v51, %v1069_v51  ;;  %v1074_v58 = vmul.f32 %v1070_v52, %v1070_v52 }
 0x25a   :  { %v1076_v59 = vadd.f32 %v1075_v55, %v1071_v53 }
 0x25b   :  { %v1079_v60 = vsel %vm1055_vm10, %v1074_v58, 0.0  ;;  %v1944_v58 = vld [vmem:[%s2577_s9] sm:$0xff]  }
 0x25c   :  { %1077 = vadd.xlane.f32.xlu0 %v1076_v59  ;;  %v1080_v61 = vadd.f32 %v1079_v60, %v1073_v57  ;;  %v1945_v59 = vld [vmem:[%s2577_s9 + $0x8] sm:$0xff]   ;;  %v1946_v60 = vld [vmem:[%s2577_s9 + $0x10] sm:$0xff]  }
 0x25e   :  { %1081 = vadd.xlane.f32.xlu1 %v1080_v61  ;;  %v1947_v61 = vld [vmem:[%s2577_s9 + $0x18] sm:$0xff]  }
 0x2e9   :  { %v1078_v7 = vpop.xlane.xlu0 %1077 }
 0x2ea   :  { %v1083_v8 = vmul.f32 0.005, %v1078_v7 }
 0x2eb   :  { %v1082_v9 = vpop.xlane.xlu1 %1081 }
 0x2ec   :  { %v1085_v10 = vadd.f32 1e-05, %v1083_v8  ;;  %v1084_v11 = vmul.f32 0.005, %v1082_v9 }
 0x2ee   :  { %1951 = vrsqrt.f32 %v1085_v10  ;;  %v1086_v12 = vadd.f32 1e-05, %v1084_v11  ;;  %v1693_v10 = vld [vmem:[%s2575_s7] ss:$0 sm:$0xff]  ;;  %s2006_s7 = smov [#allocation2]  }
 0x2ef   :  { %s1467_s8 = sshll.u32 %s2006_s7, 4  ;;  %s1468_s8 = int_to_ptr.vmem [resolvable:$true] %s1467_s8 }
 0x2f0   :  { %1953 = vrsqrt.f32 %v1086_v12  ;;  %p1972_p1 = scmp.lt.s32.totalorder %s1468_s8, %s1468_s8 }
 0x2f8   :  { %v1952_v16 = vpop.eup %1951 }
 0x2f9   :  { %v1089_v17 = vmul.f32 %v1952_v16, %v1067_v46  ;;  %v1090_v18 = vmul.f32 %v1952_v16, %v1068_v47 }
 0x2fa   :  { %v1954_v22 = vpop.eup %1953 }
 0x2fb   :  { %v1091_v23 = vmul.f32 %v1954_v22, %v1069_v51  ;;  %v1092_v56 = vmul.f32 %v1954_v22, %v1070_v52  ;;  %v1105_v24 = vmul.f32 %v1101_v15, %v1090_v18  ;;  %v1104_v25 = vmul.f32 %v1097_v6, %v1089_v17  ;;  %v1695_v22 = vld [vmem:[%s2578_s10] ss:$0 sm:$0xff]  ;;  %s1967_s10 = scalar_lea.vmem %s1468_s8, 256 }
 0x2fc   :  { %p1968_p0 = scmp.ne.s32.totalorder %s1468_s8, %s1967_s10  ;;  %p1973_p2 = scmp.lt.s32.totalorder %s1967_s10, %s1967_s10 }
 0x2fd   :  { %v1107_v26 = vmul.f32 %v1101_v15, %v1092_v56  ;;  %v1120_v27 = vadd.f32 %v1116_v49, %v1105_v24  ;;  %v1106_v28 = vmul.f32 %v1097_v6, %v1091_v23  ;;  %v1119_v48 = vadd.f32 %v1112_v21, %v1104_v25 }
 0x2fe   :  { %p1974_p3 = por %p1973_p2, %p1972_p1 }
 0x2ff   :  { %v1122_v29 = vadd.f32 %v1116_v49, %v1107_v26  ;;  %v1121_v30 = vadd.f32 %v1112_v21, %v1106_v28  ;;  %v1124_v31 = vmax.f32 %v1120_v27, 0.0  ;;  %v1123_v33 = vmax.f32 %v1119_v48, 0.0 }
 0x300   :  { %p1975_p4 = pnand %p1974_p3, %p1968_p0 }
 0x301   :  { %v1126_v32 = vmax.f32 %v1122_v29, 0.0  ;;  %v1125_v34 = vmax.f32 %v1121_v30, 0.0 }
 0x303   :  { %v1128_v35 = vpack.c.bf16 %v1126_v32, %v1124_v31  ;;  %v1127_v36 = vpack.c.bf16 %v1125_v34, %v1123_v33 }
 0x305   :  { %1692 = vmatprep.mubr.msk.bf16.mxu1 %vm1055_vm10, %v1128_v35 }
 0x306   :  { %1276 = vmatmul.mubr.bf16.vlgmr.msra.gmra.mrb[4].mxu1 %v1127_v36 }
 0x307   :  { %1713 = vmatpush3.bf16.msra.mxu1 %v1944_v58  ;;  %1726 = vmatprep.mubr.msk.bf16.mxu1 %vm2005_vm14, %v2004_v44 }
 0x308   :  { %1714 = vmatprep.subr.bf16.mxu1 %v2004_v44 }
 0x30b   :  { %1715 = vmatpush3.bf16.msra.mxu1 %v1945_v59 }
 0x30c   :  { %1716 = vmatprep.subr.bf16.mxu1 %v2004_v44 }
 0x30f   :  { %1717 = vmatpush3.bf16.msra.mxu1 %v1946_v60 }
 0x310   :  { %1718 = vmatprep.subr.bf16.mxu1 %v2004_v44 }
 0x313   :  { %1719 = vmatpush3.bf16.msra.mxu1 %v1947_v61 }
 0x314   :  { %1720 = vmatprep.subr.bf16.mxu1 %v2004_v44 }
 0x317   :  { %1721 = vmatpush3.bf16.msra.mxu1 %v1948_v62 }
 0x318   :  { %1722 = vmatprep.subr.bf16.mxu1 %v2004_v44 }
 0x31b   :  { %1723 = vmatpush3.bf16.msra.mxu1 %v1949_v63 }
 0x31c   :  { %1724 = vmatprep.subr.bf16.mxu1 %v2004_v44 }
 0x31f   :  { %1725 = vmatpush3.bf16.msra.mxu1 %v1397_v1 }
 0x3d9   :  { %v1277_v20 = vpop.f32.mrb[4].mxu1 }
 0x3da   :  { %v1278_v37 = vadd.f32 %v1678_v19, %v1277_v20  ;;  %v1279_v38 = vpop.f32.mrb[5].mxu1 }
 0x3db   :  { %v1280_v39 = vpop.f32.mrb[6].mxu1 }
 0x3dc   :  { %v1281_v40 = vadd.f32 %v1678_v19, %v1280_v39  ;;  %v1282_v41 = vpop.f32.mrb[7].mxu1  ;;  %v1287_v42 = vsel %vm1286_vm12, %v1278_v37, 0.0 }
 0x3dd   :  { %1288 = vadd.xlane.f32.xlu0 %v1287_v42 }
 0x3de   :  { %v1290_v43 = vsel %vm1286_vm12, %v1281_v40, 0.0 }
 0x3df   :  { %1291 = vadd.xlane.f32.xlu1 %v1290_v43 }
 0x46a   :  { %v1289_v45 = vpop.xlane.xlu0 %1288 }
 0x46b   :  { %v1294_v46 = vmul.f32 0.01, %v1289_v45 }
 0x46c   :  { %v1292_v47 = vpop.xlane.xlu1 %1291 }
 0x46d   :  { %v1296_v50 = vsub.f32 %v1278_v37, %v1294_v46  ;;  %v1295_v51 = vmul.f32 0.01, %v1292_v47 }
 0x46f   :  { %v1297_v52 = vsub.f32 %v1281_v40, %v1295_v51  ;;  %v1298_v53 = vmul.f32 %v1296_v50, %v1296_v50 }
 0x471   :  { %v1300_v54 = vsel %vm1286_vm12, %v1298_v53, 0.0  ;;  %v1299_v55 = vmul.f32 %v1297_v52, %v1297_v52 }
 0x472   :  { %1301 = vadd.xlane.f32.xlu0 %v1300_v54 }
 0x473   :  { %v1303_v57 = vsel %vm1286_vm12, %v1299_v55, 0.0 }
 0x474   :  { %1304 = vadd.xlane.f32.xlu1 %v1303_v57 }
 0x4ff   :  { %v1302_v2 = vpop.xlane.xlu0 %1301 }
 0x500   :  { %v1306_v3 = vmul.f32 0.01, %v1302_v2 }
 0x501   :  { %v1305_v4 = vpop.xlane.xlu1 %1304 }
 0x502   :  { %v1308_v5 = vadd.f32 1e-05, %v1306_v3  ;;  %v1307_v7 = vmul.f32 0.01, %v1305_v4 }
 0x504   :  { %1955 = vrsqrt.f32 %v1308_v5  ;;  %v1309_v8 = vadd.f32 1e-05, %v1307_v7 }
 0x506   :  { %1957 = vrsqrt.f32 %v1309_v8 }
 0x50e   :  { %v1956_v9 = vpop.eup %1955 }
 0x50f   :  { %v1312_v11 = vmul.f32 %v1956_v9, %v1296_v50 }
 0x510   :  { %v1958_v12 = vpop.eup %1957 }
 0x511   :  { %v1320_v14 = vmul.f32 %v1693_v10, %v1312_v11  ;;  %v1313_v6 = vmul.f32 %v1958_v12, %v1297_v52 }
 0x513   :  { %v1321_v15 = vmul.f32 %v1693_v10, %v1313_v6  ;;  %v1328_v16 = vadd.f32 %v1694_v13, %v1320_v14 }
 0x515   :  { %v1329_v17 = vadd.f32 %v1694_v13, %v1321_v15  ;;  %v1330_v18 = vmax.f32 %v1328_v16, 0.0 }
 0x517   :  { %v1331_v49 = vmax.f32 %v1329_v17, 0.0 }
 0x519   :  { %v1332_v21 = vpack.c.bf16 %v1331_v49, %v1330_v18 }
 0x51b   :  { %1727 = vmatmul.mubr.msk.bf16.vlgmr.msra.gmra.mrb[8].mxu1 %vm1286_vm12, %v1332_v21 }
 0x5ee   :  { %v1433_v23 = vpop.f32.mrb[8].mxu1 }
 0x5ef   :  { %v1434_v56 = vadd.f32 %v1695_v22, %v1433_v23  ;;  %v1728_v24 = vpop.f32.mrb[9].mxu1 }
 0x5f0   :  { %v1436_v25 = vpop.f32.mrb[10].mxu1 }
 0x5f1   :  { %v1437_v26 = vadd.f32 %v1695_v22, %v1436_v25  ;;  %1440 = vmax.xlane.f32.xlu0 %v1434_v56  ;;  %v1729_v27 = vpop.f32.mrb[11].mxu1 }
 0x5f3   :  { %1442 = vmax.xlane.f32.xlu1 %v1437_v26 }
 0x67e   :  { %v1441_v28 = vpop.xlane.xlu0 %1440 }
 0x67f   :  { %v1444_v48 = vsub.f32 %v1434_v56, %v1441_v28 }
 0x680   :  { %v1443_v29 = vpop.xlane.xlu1 %1442 }
 0x681   :  { %v1446_v30 = vmul.f32 1.442695, %v1444_v48  ;;  %v1445_v31 = vsub.f32 %v1437_v26, %v1443_v29 }
 0x683   :  { %1959 = vpow2.f32 %v1446_v30  ;;  %v1448_v32 = vmul.f32 1.442695, %v1445_v31 }
 0x685   :  { %1961 = vpow2.f32 %v1448_v32 }
 0x68d   :  { %v1960_v33 = vpop.eup %1959 }
 0x68e   :  { %1450 = vadd.xlane.f32.xlu0 %v1960_v33 }
 0x68f   :  { %v1962_v34 = vpop.eup %1961 }
 0x690   :  { %1452 = vadd.xlane.f32.xlu1 %v1962_v34 }
 0x71b   :  { %v1451_v35 = vpop.xlane.xlu0 %1450 }
 0x71c   :  { %1963 = vlog2.f32 %v1451_v35 }
 0x71d   :  { %v1453_v36 = vpop.xlane.xlu1 %1452 }
 0x71e   :  { %1965 = vlog2.f32 %v1453_v36 }
 0x726   :  { %v1964_v19 = vpop.eup %1963 }
 0x727   :  { %v1455_v20 = vmul.f32 0.6931472, %v1964_v19 }
 0x728   :  { %v1966_v37 = vpop.eup %1965 }
 0x729   :  { %v1458_v38 = vsub.f32 %v1444_v48, %v1455_v20  ;;  %v1457_v39 = vmul.f32 0.6931472, %v1966_v37 }
 0x72b   :  { %1460 = vst [vmem:[#allocation2] sm:$0xff] %v1458_v38  ;;  %v1459_v40 = vsub.f32 %v1445_v31, %v1457_v39 }
 0x72d   :  { %1461 = vst [vmem:[#allocation2 + $0x8] sm:$0xff] %v1459_v40 }
 0x72e   :  { %1978 = shalt.err (!%p1975_p4)
}
 0x72f   :  { %s1979_s18 = scalar_lea.hbm %s2579_s11, 256 }
 0x730   :  { %p1980_p5 = scmp.ne.s32.totalorder %s2579_s11, %s1979_s18  ;;  %p1983_p6 = scmp.lt.u32.totalorder %s1979_s18, %s2579_s11 }
 0x732   :  { %p1985_p7 = pnand %p1983_p6, %p1980_p5 }
 0x734   :  { %1988 = shalt.err (!%p1985_p7)
}
 0x735   :  { %s2007_s6 = smov 128   ;;  %s2008_s20 = smov 8  }
 0x736   :  { %1473 = dma.vmem_to_hbm [thread:$0]  %s1468_s8, 256, %s2579_s11, [#allocation3], %s2007_s6, %s2007_s6, %s2008_s20  }
 0x737   :  { %1989 = dma.done.wait [#allocation3], 256  }
 0x738   :  { %1990 = vsyncadd [#allocation3], 4294967040 }
 0x739   :  { %1477 = vsyncpa [#allocation3], 1 }

</bundles_post_ra>
